<compile_context>
chip_gen: v7x
topology: tpu7x:2x2x1
jax: 0.10.0
libtpu: 0.0.40
codegen_flags: <defaults>
</compile_context>

<pallas_src>
import jax
import jax.numpy as jnp
from jax.experimental import pallas as pl
from jax.experimental.pallas import tpu as pltpu


# ---------------------------------------------------------------------------
# Chip / layout helpers
# ---------------------------------------------------------------------------

def _device_kind():
    try:
        return jax.devices()[0].device_kind.lower()
    except Exception:
        return ""


def _sublane_min(dtype):
    """Minimum packed sublane count: 8 for 4-byte, 16 for 2-byte, 32 for 1-byte."""
    itemsize = jnp.dtype(dtype).itemsize
    return max(8, 32 // max(1, itemsize))


def _pick_lane(total):
    """Largest lane width (multiple of 128) that divides `total`.

    Returns (lane, needs_pad). Padding only when total is not a multiple of 128.
    """
    for lane in (1024, 512, 256, 128):
        if total % lane == 0:
            return lane, False
    return 128, True


def _pick_tile_rows(rows, target_rows, sub_min, split_for_megacore):
    """Choose the row-tile size.

    Prefers (a) one full block for small tensors (optionally split in two on
    v7x so both TensorCores get work), (b) a divisor of `rows` that is a
    multiple of the packed sublane minimum so every block is full and stores
    are unmasked, (c) otherwise the largest sub_min-aligned tile <= target,
    accepting one masked tail block (correct for the identity copy).
    """
    if rows <= target_rows:
        if split_for_megacore and rows % (2 * sub_min) == 0:
            return rows // 2
        return rows
    top = max(sub_min, (target_rows // sub_min) * sub_min)
    for cand in range(top, sub_min - 1, -sub_min):
        if rows % cand == 0:
            return cand
    return top


# ---------------------------------------------------------------------------
# Pallas identity bend (placeholder for a real subclass bend body)
# ---------------------------------------------------------------------------

def _bend_identity_kernel(x_ref, o_ref):
    # The "bend" hot path.  For the base class this is a pass-through of the
    # shape-normalized input (element-wise copy through VMEM).
    o_ref[...] = x_ref[...]


def pallas_identity_bend(x4):
    """Run the Pallas bend kernel on a 4D NCHW tensor (lane-dense 2D layout)."""
    n, c, h, w = x4.shape
    total = n * c * h * w
    dtype = x4.dtype
    itemsize = jnp.dtype(dtype).itemsize
    sub_min = _sublane_min(dtype)

    kind = _device_kind()
    is_v5 = "v5" in kind
    is_v7 = "v7" in kind
    # 2 MiB tiles on v5e (16 MiB default scoped VMEM), 4 MiB on v6e/v7x
    # (32 MiB default scoped VMEM; 16 MiB double-buffered working set).
    target_block_bytes = (2 << 20) if is_v5 else (4 << 20)

    flat = x4.reshape(total)
    lane, needs_pad = _pick_lane(total)
    if needs_pad:
        # Rare misaligned path: pad to a multiple of 128 lanes (one extra
        # HBM pass; sliced off after the kernel).
        padded_total = -(-total // lane) * lane
        flat = jnp.pad(flat, (0, padded_total - total))
    else:
        padded_total = total

    rows = padded_total // lane
    x2d = flat.reshape(rows, lane)

    target_rows = max(sub_min, target_block_bytes // (lane * itemsize))
    tile_rows = _pick_tile_rows(rows, target_rows, sub_min,
                                split_for_megacore=is_v7)
    grid_rows = -(-rows // tile_rows)

    out2d = pl.pallas_call(
        _bend_identity_kernel,
        out_shape=jax.ShapeDtypeStruct((rows, lane), dtype),
        grid=(grid_rows,),
        in_specs=[pl.BlockSpec((tile_rows, lane), lambda i: (i, 0))],
        out_specs=pl.BlockSpec((tile_rows, lane), lambda i: (i, 0)),
        compiler_params=pltpu.CompilerParams(
            dimension_semantics=("parallel",)
        ),
    )(x2d)

    out_flat = out2d.reshape(padded_total)
    if needs_pad:
        out_flat = out_flat[:total]
    return out_flat.reshape(n, c, h, w)


# ---------------------------------------------------------------------------
# Forward pass (mirrors BendingModule.forward)
# ---------------------------------------------------------------------------

def bending_module_forward(x, bend_fn=None):
    """Mirrors BendingModule.forward: normalize to 4D, bend, squeeze back.

    `bend_fn` is the subclass bend body (a function of the 4D tensor).  When
    None, the identity bend is short-circuited -- the shape-normalized input
    is returned directly with no kernel launch and no extra HBM traffic.
    Pass `pallas_identity_bend` to route the identity through the Pallas
    kernel (the hook a real subclass bend would use).
    """
    num_unsqueeze_added = 0
    if x.ndim == 2:
        x = x[None, None]            # unsqueeze(0).unsqueeze(0)
        num_unsqueeze_added = 2
    if x.ndim == 3:
        x = x[None]                  # unsqueeze(0)
        num_unsqueeze_added = 1
    elif x.ndim != 4:
        raise ValueError(f"Input tensor must be 3D or 4D, but got ndim={x.ndim}")

    if bend_fn is None:
        output = x                   # identity bend: no pallas_call needed
    else:
        output = bend_fn(x)

    for _ in range(num_unsqueeze_added):
        output = output[0]           # squeeze(0) on a size-1 leading dim
    return output


if __name__ == "__main__":
    key = jax.random.PRNGKey(0)
    k2d, k3d, k4d, kbig, kodd = jax.random.split(key, 5)

    # 4D input (N, C, H, W) -- canonical case, routed through the Pallas bend.
    x4 = jax.random.normal(k4d, (2, 4, 16, 16), dtype=jnp.float32)
    y4 = jax.block_until_ready(
        bending_module_forward(x4, bend_fn=pallas_identity_bend))
    assert y4.shape == x4.shape
    assert jnp.allclose(y4, x4)

    # Default path: identity bend short-circuit (no kernel launch).
    y4_fast = jax.block_until_ready(bending_module_forward(x4))
    assert y4_fast.shape == x4.shape
    assert jnp.allclose(y4_fast, x4)

    # 3D input -- single unsqueeze/squeeze path, Pallas bend.
    x3 = jax.random.normal(k3d, (4, 16, 16), dtype=jnp.float32)
    y3 = jax.block_until_ready(
        bending_module_forward(x3, bend_fn=pallas_identity_bend))
    assert y3.shape == x3.shape
    assert jnp.allclose(y3, x3)

    # 2D input -- double unsqueeze/squeeze path (lane width falls back to 256).
    x2 = jax.random.normal(k2d, (16, 16), dtype=jnp.float32)
    y2 = jax.block_until_ready(
        bending_module_forward(x2, bend_fn=pallas_identity_bend))
    assert y2.shape == x2.shape
    assert jnp.allclose(y2, x2)

    # Larger 4D input -- lane-dense 1024-wide blocks, possibly multi-block grid.
    xb = jax.random.normal(kbig, (2, 8, 64, 64), dtype=jnp.float32)
    yb = jax.block_until_ready(
        bending_module_forward(xb, bend_fn=pallas_identity_bend))
    assert yb.shape == xb.shape
    assert jnp.allclose(yb, xb)

    # Misaligned 4D input -- exercises the rare padded fallback path.
    xo = jax.random.normal(kodd, (3, 5, 7, 9), dtype=jnp.float32)
    yo = jax.block_until_ready(
        bending_module_forward(xo, bend_fn=pallas_identity_bend))
    assert yo.shape == xo.shape
    assert jnp.allclose(yo, xo)

    print("KERNEL_OK")
</pallas_src>

<mosaic_0001>
module attributes {stable_mosaic.version = 11 : i64} {
  func.func @_bend_identity_kernel(%arg0: i32, %arg1: memref<2x1024xf32, #tpu.memory_space<vmem>>, %arg2: memref<2x1024xf32, #tpu.memory_space<vmem>>) attributes {dimension_semantics = [#tpu.dimension_semantics<parallel>], iteration_bounds = array<i64: 1>, scalar_prefetch = 0 : i64, scratch_operands = 0 : i64, tpu.core_type = #tpu.core_type<tc>, window_params = [{transform_indices = @transform_0, window_bounds = array<i64: 2, 1024>}, {transform_indices = @transform_1, window_bounds = array<i64: 2, 1024>}]} {
    %c0 = arith.constant 0 : index
    %c0_0 = arith.constant 0 : index
    %0 = vector.load %arg1[%c0, %c0_0] : memref<2x1024xf32, #tpu.memory_space<vmem>>, vector<2x1024xf32>
    %c0_1 = arith.constant 0 : index
    %c0_2 = arith.constant 0 : index
    %1 = vector.load %arg2[%c0_1, %c0_2] : memref<2x1024xf32, #tpu.memory_space<vmem>>, vector<2x1024xf32>
    tpu.vector_store %arg2[%c0_1, %c0_2], %0 {strides = array<i32>} : memref<2x1024xf32, #tpu.memory_space<vmem>>, vector<2x1024xf32>,
    return
  }
  func.func @transform_0(%arg0: i32) -> (i32, i32) {
    %c0_i32 = arith.constant 0 : i32
    %c0_i32_0 = arith.constant 0 : i32
    return %arg0, %c0_i32 : i32, i32
  }
  func.func @transform_1(%arg0: i32) -> (i32, i32) {
    %c0_i32 = arith.constant 0 : i32
    %c0_i32_0 = arith.constant 0 : i32
    return %arg0, %c0_i32 : i32, i32
  }
}

</mosaic_0001>

<bundles_post_ra>
// kernel: tpu_custom_call.1
= control target key start
LH: loop header
LB: loop body
LE: loop exit
PB: predicated region body
PF: predicated region fallthrough
CT: control target
= control target key end

     0   :  { %6 = vsyncpa [#allocation3], 0  ;;  %s126_s0 = inlined_call_operand.hbm [shape: f32[2,1024], index: 0, kind: input, shape index: {}]   ;;  %s127_s1 = inlined_call_operand.hbm [shape: f32[2,1024], index: 1, kind: output, shape index: {}]  }
   0x1   :  { %7 = vsyncpa [#allocation4], 0  ;;  %s90_s6 = smov [#allocation2]   ;;  %s42_s10 = scalar_lea.hbm %s126_s0, 256 }
   0x2   :  { %s14_s7 = sshll.u32 %s90_s6, 4  ;;  %p43_p0 = scmp.ne.s32.totalorder %s126_s0, %s42_s10  ;;  %s15_s7 = int_to_ptr.vmem [resolvable:$true] %s14_s7 }
   0x3   :  { %p46_p1 = scmp.lt.u32.totalorder %s42_s10, %s126_s0 }
   0x5   :  { %p48_p2 = pnand %p46_p1, %p43_p0 }
   0x7   :  { %51 = shalt.err (!%p48_p2)
}
   0x8   :  { %s52_s15 = scalar_lea.vmem %s15_s7, 256  ;;  %p57_p4 = scmp.lt.s32.totalorder %s15_s7, %s15_s7 }
   0x9   :  { %p53_p3 = scmp.ne.s32.totalorder %s15_s7, %s52_s15  ;;  %p58_p5 = scmp.lt.s32.totalorder %s52_s15, %s52_s15 }
   0xb   :  { %p59_p6 = por %p58_p5, %p57_p4 }
   0xd   :  { %p60_p7 = pnand %p59_p6, %p53_p3 }
   0xf   :  { %63 = shalt.err (!%p60_p7)
}
  0x10   :  { %17 = dma.hbm_to_vmem [thread:$0]  %s126_s0, 256, %s15_s7, [#allocation3]  }
  0x11   :  { %86 = dma.done.wait [#allocation3], 256  }
  0x12   :  { %87 = vsyncadd [#allocation3], 4294967040  ;;  %s91_s18 = smov [#allocation5]   ;;  %v21_v0 = vld [vmem:[#allocation2] sm:$0xff]  ;;  %v22_v1 = vld [vmem:[#allocation2 + $0x8] sm:$0xff] }
  0x13   :  { %s31_s19 = sshll.u32 %s91_s18, 4  ;;  %23 = vst [vmem:[#allocation5] sm:$0xff] %v21_v0  ;;  %24 = vst [vmem:[#allocation5 + $0x8] sm:$0xff] %v22_v1  ;;  %s32_s19 = int_to_ptr.vmem [resolvable:$true] %s31_s19 }
  0x14   :  { %s64_s20 = scalar_lea.vmem %s32_s19, 256  ;;  %p69_p9 = scmp.lt.s32.totalorder %s32_s19, %s32_s19 }
  0x15   :  { %p65_p8 = scmp.ne.s32.totalorder %s32_s19, %s64_s20  ;;  %p70_p10 = scmp.lt.s32.totalorder %s64_s20, %s64_s20 }
  0x17   :  { %p71_p11 = por %p70_p10, %p69_p9 }
  0x19   :  { %p72_p12 = pnand %p71_p11, %p65_p8 }
  0x1b   :  { %75 = shalt.err (!%p72_p12)
}
  0x1c   :  { %s76_s0 = scalar_lea.hbm %s127_s1, 256 }
  0x1d   :  { %p77_p13 = scmp.ne.s32.totalorder %s127_s1, %s76_s0  ;;  %p80_p0 = scmp.lt.u32.totalorder %s76_s0, %s127_s1 }
  0x1f   :  { %p82_p1 = pnand %p80_p0, %p77_p13 }
  0x21   :  { %85 = shalt.err (!%p82_p1)
}
  0x22   :  { %34 = dma.vmem_to_hbm [thread:$0]  %s32_s19, 256, %s127_s1, [#allocation4]  }
  0x23   :  { %88 = dma.done.wait [#allocation4], 256  }
  0x24   :  { %89 = vsyncadd [#allocation4], 4294967040 }
  0x25   :  { %38 = vsyncpa [#allocation3], 1 }
  0x26   :  { %39 = vsyncpa [#allocation4], 1 }

</bundles_post_ra>
